<compile_context>
chip_gen: v7x
topology: tpu7x:2x2x1
jax: 0.10.0
libtpu: 0.0.40
codegen_flags: <defaults>
</compile_context>

<pallas_src>
import functools

import numpy as np
import jax
import jax.numpy as jnp
from jax.experimental import pallas as pl
from jax.experimental.pallas import tpu as pltpu


# ----------------------------- parameter init -----------------------------
def orthogonal_init(key, out_features, in_features, gain):
    """Deterministic orthogonal init (same spirit as nn.init.orthogonal_)."""
    rows, cols = out_features, in_features
    transpose = rows < cols
    shape = (cols, rows) if transpose else (rows, cols)
    a = jax.random.normal(key, shape, dtype=jnp.float32)
    q, r = jnp.linalg.qr(a)
    d = jnp.sign(jnp.diagonal(r))
    q = q * d[None, :]
    if transpose:
        q = q.T
    # q has shape (out_features, in_features); return as (in, out) for x @ W
    return (gain * q).T.astype(jnp.float32)


def make_params(key, input_size, hidden_layers, output_size):
    gain = float(np.sqrt(2.0))
    sizes = [input_size] + list(hidden_layers) + [output_size]
    params = []
    for i in range(len(sizes) - 1):
        key, sub = jax.random.split(key)
        w = orthogonal_init(sub, sizes[i + 1], sizes[i], gain)      # (in, out)
        b = jnp.zeros((1, sizes[i + 1]), dtype=jnp.float32)         # (1, out)
        params.append((w, b))
    return params


def _round_up(n, m):
    return ((n + m - 1) // m) * m


def _supports_bf16_vpu():
    """v6e / v7x have a bf16 VALU; v5e (and older) do not."""
    try:
        kind = jax.devices()[0].device_kind.lower()
    except Exception:
        return False
    return ("v6" in kind) or ("v7" in kind)


def _choose_block_b(batch, target=1024, min_steps=2):
    """Pick the batch tile: big (amortize ~0.35us/step), capped at
    round_up(B, 128) (no padded garbage rows for tiny batches), and shrunk so
    the grid has >= min_steps whenever the batch allows (v7x: 2 TensorCores)."""
    rounded = _round_up(max(int(batch), 1), 128)
    block_b = min(target, rounded)
    while rounded > 128 and block_b > 128 and ((rounded + block_b - 1) // block_b) < min_steps:
        block_b = max(128, _round_up(block_b // 2, 128))
    return block_b


def prepare_params(params, x_dim, act_dim, *, h_pad=128, act_pad=16,
                   bf16_elementwise=False):
    """Trace-time prep: split w1 (fuses the concat), zero-pad hidden widths to
    h_pad (lane-dense, numerically identical), zero-pad the action rows of w1
    to act_pad (so the action term is a clean small bf16 MXU matmul), cast MXU
    weights to bf16. b1 is emitted in the elementwise compute dtype."""
    (w1, b1), (w2, b2), (w3, b3) = params
    h1 = w1.shape[1]
    h2 = w2.shape[1]
    assert w1.shape[0] == x_dim + act_dim
    ew_dtype = jnp.bfloat16 if bf16_elementwise else jnp.float32
    w1x = jnp.pad(w1[:x_dim], ((0, 0), (0, h_pad - h1))).astype(jnp.bfloat16)
    w1a = jnp.pad(w1[x_dim:], ((0, act_pad - act_dim), (0, h_pad - h1))).astype(jnp.bfloat16)
    b1p = jnp.pad(b1, ((0, 0), (0, h_pad - h1))).astype(ew_dtype)
    w2p = jnp.pad(w2, ((0, h_pad - h1), (0, h_pad - h2))).astype(jnp.bfloat16)
    b2p = jnp.pad(b2, ((0, 0), (0, h_pad - h2))).astype(jnp.float32)
    w3t = jnp.pad(w3, ((0, h_pad - h2), (0, 0))).T.astype(jnp.float32)   # (1, h_pad)
    b3s = b3.reshape(-1).astype(jnp.float32)                             # (1,)
    return (w1x, w1a, b1p, w2p, b2p, w3t, b3s)


# ------------------------------ Pallas kernel ------------------------------
def critic_mlp_kernel(x_ref, a_ref, w1x_ref, w1a_ref, b1_ref,
                      w2_ref, b2_ref, w3_ref, b3_ref, o_ref,
                      *, bf16_elementwise):
    # Layer 1: both the x contribution and the (zero-padded) action
    # contribution run on the MXU (bf16 operands, f32 accumulate). MXU has
    # huge slack in this kernel, so this frees VPU/XLU slots.
    h1 = jnp.dot(x_ref[...].astype(jnp.bfloat16), w1x_ref[...],
                 preferred_element_type=jnp.float32)
    h1 = h1 + jnp.dot(a_ref[...].astype(jnp.bfloat16), w1a_ref[...],
                      preferred_element_type=jnp.float32)
    if bf16_elementwise:
        # v6e / v7x: bf16 VALU -> half the vregs for bias + ReLU; h1 was going
        # to be cast to bf16 for the next MXU pass anyway.
        h1 = jnp.maximum(h1.astype(jnp.bfloat16) + b1_ref[...], 0)
    else:
        # v5e: no bf16 VPU path; keep elementwise math in f32, cast at the end.
        h1 = jnp.maximum(h1 + b1_ref[...], 0.0).astype(jnp.bfloat16)

    # Layer 2: Linear + ReLU (bf16 MXU, f32 accumulate / elementwise).
    h2 = jnp.dot(h1, w2_ref[...], preferred_element_type=jnp.float32)
    h2 = jnp.maximum(h2 + b2_ref[...], 0.0)

    # Output layer (H -> 1): lane reduction, then a small (block_b,1) ->
    # (1,block_b) transpose so the store is lane-dense (unmasked vst) instead
    # of 1-lane-per-vreg masked partial stores.
    v = jnp.sum(h2 * w3_ref[...], axis=-1, keepdims=True) + b3_ref[0]   # (block_b, 1)
    o_ref[0] = v.T                                                      # (1, block_b)


def critic_linear_forward(x, action, prepared, *, block_b=None,
                          target_block_b=1024, bf16_elementwise=None):
    """CriticLinear.forward. Batch is tiled over a 'parallel' grid; the concat
    is fused into the kernel via the split w1; output is stored lane-dense."""
    w1x, w1a, b1, w2, b2, w3t, b3 = prepared
    if bf16_elementwise is None:
        bf16_elementwise = (b1.dtype == jnp.bfloat16)

    B = x.shape[0]
    if block_b is None:
        block_b = _choose_block_b(B, target=target_block_b)
    Bp = _round_up(B, block_b)
    num_blocks = Bp // block_b
    act_pad = w1a.shape[0]

    if Bp != B:
        x = jnp.pad(x, ((0, Bp - B), (0, 0)))
    if Bp != B or action.shape[1] != act_pad:
        action = jnp.pad(action, ((0, Bp - B), (0, act_pad - action.shape[1])))

    resident = lambda arr: pl.BlockSpec(arr.shape, lambda i: (0, 0))
    kernel = functools.partial(critic_mlp_kernel, bf16_elementwise=bf16_elementwise)

    out = pl.pallas_call(
        kernel,
        # Lane-dense output: one (1, block_b) row per grid step.
        out_shape=jax.ShapeDtypeStruct((num_blocks, 1, block_b), jnp.float32),
        grid=(num_blocks,),
        in_specs=[
            pl.BlockSpec((block_b, x.shape[1]), lambda i: (i, 0)),       # x tile
            pl.BlockSpec((block_b, act_pad), lambda i: (i, 0)),          # action tile (padded)
            resident(w1x), resident(w1a), resident(b1),                  # VMEM-resident weights
            resident(w2), resident(b2), resident(w3t),
            pl.BlockSpec(memory_space=pltpu.MemorySpace.SMEM),           # b3 scalar
        ],
        out_specs=pl.BlockSpec((1, 1, block_b), lambda i: (i, 0, 0)),
        compiler_params=pltpu.CompilerParams(
            dimension_semantics=("parallel",)),   # v7x: shard batch steps over 2 TCs
    )(x, action, w1x, w1a, b1, w2, b2, w3t, b3)

    return out.reshape(-1, 1)[:B]


# -------------------------- matched-precision ref --------------------------
def reference_forward(x, action, prepared, bf16_elementwise):
    # Same bf16-on-MXU / f32-accumulate math as the kernel. bf16 MXU operands
    # introduce ~1% deviation vs the original fp32 PyTorch forward; structure
    # and semantics are identical (flag it if downstream needs fp32 parity).
    w1x, w1a, b1, w2, b2, w3t, b3 = prepared
    act_pad = w1a.shape[0]
    a = jnp.pad(action, ((0, 0), (0, act_pad - action.shape[1])))
    h1 = jnp.dot(x.astype(jnp.bfloat16), w1x, preferred_element_type=jnp.float32)
    h1 = h1 + jnp.dot(a.astype(jnp.bfloat16), w1a, preferred_element_type=jnp.float32)
    if bf16_elementwise:
        h1 = jnp.maximum(h1.astype(jnp.bfloat16) + b1, 0)
    else:
        h1 = jnp.maximum(h1 + b1, 0.0).astype(jnp.bfloat16)
    h2 = jnp.dot(h1, w2, preferred_element_type=jnp.float32)
    h2 = jnp.maximum(h2 + b2, 0.0)
    return jnp.sum(h2 * w3t, axis=-1, keepdims=True) + b3[0]


# --------------------------------- main ------------------------------------
if __name__ == "__main__":
    # Synthetic config (mirrors config_model fields used by CriticLinear):
    size_of_fused_layers = 32
    additional_input = 0
    add_action = True
    critic_layers = [64, 64]
    x_dim = size_of_fused_layers + additional_input        # 32
    act_dim = 2 if add_action else 0                        # 2
    input_size = x_dim + act_dim                            # 34

    key = jax.random.PRNGKey(0)
    k_params, k_data = jax.random.split(key)

    bf16_ew = _supports_bf16_vpu()
    params = make_params(k_params, input_size, critic_layers, 1)
    prepared = prepare_params(params, x_dim, act_dim, bf16_elementwise=bf16_ew)

    # Two cases: tiny batch (single grid step, launch-bound by design) and a
    # larger batch that exercises multi-step grid + batch padding.
    for B in (8, 384):
        kx, ka = jax.random.split(jax.random.fold_in(k_data, B))
        x = jax.random.normal(kx, (B, x_dim), dtype=jnp.float32)
        action = jax.random.normal(ka, (B, act_dim), dtype=jnp.float32)

        value = critic_linear_forward(x, action, prepared, bf16_elementwise=bf16_ew)
        jax.block_until_ready(value)

        ref = reference_forward(x, action, prepared, bf16_ew)
        np.testing.assert_allclose(np.asarray(value), np.asarray(ref),
                                   rtol=5e-3, atol=5e-3)
        assert value.shape == (B, 1)

    print("KERNEL_OK")
</pallas_src>

<mosaic_0001>
module attributes {stable_mosaic.version = 11 : i64} {
  func.func @critic_mlp_kernel(%arg0: i32, %arg1: memref<128x32xf32, #tpu.memory_space<vmem>>, %arg2: memref<128x16xf32, #tpu.memory_space<vmem>>, %arg3: memref<32x128xbf16, #tpu.memory_space<vmem>>, %arg4: memref<16x128xbf16, #tpu.memory_space<vmem>>, %arg5: memref<1x128xf32, #tpu.memory_space<vmem>>, %arg6: memref<128x128xbf16, #tpu.memory_space<vmem>>, %arg7: memref<1x128xf32, #tpu.memory_space<vmem>>, %arg8: memref<1x128xf32, #tpu.memory_space<vmem>>, %arg9: memref<1xf32, #tpu.memory_space<smem>>, %arg10: memref<1x1x128xf32, #tpu.memory_space<vmem>>) attributes {dimension_semantics = [#tpu.dimension_semantics<parallel>], iteration_bounds = array<i64: 1>, scalar_prefetch = 0 : i64, scratch_operands = 0 : i64, tpu.core_type = #tpu.core_type<tc>, window_params = [{transform_indices = @transform_0, window_bounds = array<i64: 128, 32>}, {transform_indices = @transform_1, window_bounds = array<i64: 128, 16>}, {pipeline_mode = #tpu.pipeline_mode<synchronous>, transform_indices = @transform_2, window_bounds = array<i64: 32, 128>}, {pipeline_mode = #tpu.pipeline_mode<synchronous>, transform_indices = @transform_3, window_bounds = array<i64: 16, 128>}, {pipeline_mode = #tpu.pipeline_mode<synchronous>, transform_indices = @transform_4, window_bounds = array<i64: 1, 128>}, {pipeline_mode = #tpu.pipeline_mode<synchronous>, transform_indices = @transform_5, window_bounds = array<i64: 128, 128>}, {pipeline_mode = #tpu.pipeline_mode<synchronous>, transform_indices = @transform_6, window_bounds = array<i64: 1, 128>}, {pipeline_mode = #tpu.pipeline_mode<synchronous>, transform_indices = @transform_7, window_bounds = array<i64: 1, 128>}, {transform_indices = @transform_8, window_bounds = array<i64: 1>}, {transform_indices = @transform_9, window_bounds = array<i64: 1, 1, 128>}]} {
    %c0 = arith.constant 0 : index
    %c0_0 = arith.constant 0 : index
    %0 = vector.load %arg1[%c0, %c0_0] : memref<128x32xf32, #tpu.memory_space<vmem>>, vector<128x32xf32>
    %1 = arith.truncf %0 : vector<128x32xf32> to vector<128x32xbf16>
    %c0_1 = arith.constant 0 : index
    %c0_2 = arith.constant 0 : index
    %2 = vector.load %arg3[%c0_1, %c0_2] : memref<32x128xbf16, #tpu.memory_space<vmem>>, vector<32x128xbf16>
    %cst = arith.constant dense<0.000000e+00> : vector<128x128xf32>
    %3 = tpu.matmul %1, %2, %cst {dimension_numbers = #tpu.dot_dimension_numbers<[1], [0], [0], [1], [0, 0, 1, 1], [], []>} : vector<128x32xbf16>, vector<32x128xbf16>, vector<128x128xf32> -> vector<128x128xf32>
    %c0_3 = arith.constant 0 : index
    %c0_4 = arith.constant 0 : index
    %4 = vector.load %arg2[%c0_3, %c0_4] : memref<128x16xf32, #tpu.memory_space<vmem>>, vector<128x16xf32>
    %5 = arith.truncf %4 : vector<128x16xf32> to vector<128x16xbf16>
    %c0_5 = arith.constant 0 : index
    %c0_6 = arith.constant 0 : index
    %6 = vector.load %arg4[%c0_5, %c0_6] : memref<16x128xbf16, #tpu.memory_space<vmem>>, vector<16x128xbf16>
    %cst_7 = arith.constant dense<0.000000e+00> : vector<128x128xf32>
    %7 = tpu.matmul %5, %6, %cst_7 {dimension_numbers = #tpu.dot_dimension_numbers<[1], [0], [0], [1], [0, 0, 1, 1], [], []>} : vector<128x16xbf16>, vector<16x128xbf16>, vector<128x128xf32> -> vector<128x128xf32>
    %8 = arith.addf %3, %7 : vector<128x128xf32>
    %c0_8 = arith.constant 0 : index
    %c0_9 = arith.constant 0 : index
    %9 = vector.load %arg5[%c0_8, %c0_9] : memref<1x128xf32, #tpu.memory_space<vmem>>, vector<1x128xf32>
    %10 = vector.broadcast %9 : vector<1x128xf32> to vector<128x128xf32>
    %11 = arith.addf %8, %10 : vector<128x128xf32>
    %cst_10 = arith.constant 0.000000e+00 : f32
    %12 = vector.broadcast %cst_10 : f32 to vector<128x128xf32>
    %13 = arith.maximumf %11, %12 : vector<128x128xf32>
    %14 = arith.truncf %13 : vector<128x128xf32> to vector<128x128xbf16>
    %c0_11 = arith.constant 0 : index
    %c0_12 = arith.constant 0 : index
    %15 = vector.load %arg6[%c0_11, %c0_12] : memref<128x128xbf16, #tpu.memory_space<vmem>>, vector<128x128xbf16>
    %cst_13 = arith.constant dense<0.000000e+00> : vector<128x128xf32>
    %16 = tpu.matmul %14, %15, %cst_13 {dimension_numbers = #tpu.dot_dimension_numbers<[1], [0], [0], [1], [0, 0, 1, 1], [], []>} : vector<128x128xbf16>, vector<128x128xbf16>, vector<128x128xf32> -> vector<128x128xf32>
    %c0_14 = arith.constant 0 : index
    %c0_15 = arith.constant 0 : index
    %17 = vector.load %arg7[%c0_14, %c0_15] : memref<1x128xf32, #tpu.memory_space<vmem>>, vector<1x128xf32>
    %18 = vector.broadcast %17 : vector<1x128xf32> to vector<128x128xf32>
    %19 = arith.addf %16, %18 : vector<128x128xf32>
    %cst_16 = arith.constant 0.000000e+00 : f32
    %20 = vector.broadcast %cst_16 : f32 to vector<128x128xf32>
    %21 = arith.maximumf %19, %20 : vector<128x128xf32>
    %c0_17 = arith.constant 0 : index
    %c0_18 = arith.constant 0 : index
    %22 = vector.load %arg8[%c0_17, %c0_18] : memref<1x128xf32, #tpu.memory_space<vmem>>, vector<1x128xf32>
    %23 = vector.broadcast %22 : vector<1x128xf32> to vector<128x128xf32>
    %24 = arith.mulf %21, %23 : vector<128x128xf32>
    %cst_19 = arith.constant dense<0.000000e+00> : vector<128xf32>
    %25 = vector.multi_reduction <add>, %24, %cst_19 [1] : vector<128x128xf32> to vector<128xf32>
    %26 = vector.shape_cast %25 : vector<128xf32> to vector<128x1xf32>
    %c0_20 = arith.constant 0 : index
    %27 = memref.load %arg9[%c0_20] : memref<1xf32, #tpu.memory_space<smem>>
    %28 = vector.broadcast %27 : f32 to vector<128x1xf32>
    %29 = arith.addf %26, %28 : vector<128x1xf32>
    %30 = tpu.transpose %29, [1, 0] : vector<128x1xf32> -> vector<1x128xf32>
    %c0_21 = arith.constant 0 : index
    %c0_22 = arith.constant 0 : index
    %c0_23 = arith.constant 0 : index
    %31 = vector.load %arg10[%c0_21, %c0_22, %c0_23] : memref<1x1x128xf32, #tpu.memory_space<vmem>>, vector<1x1x128xf32>
    %32 = vector.shape_cast %31 : vector<1x1x128xf32> to vector<1x128xf32>
    %33 = vector.shape_cast %30 : vector<1x128xf32> to vector<1x1x128xf32>
    tpu.vector_store %arg10[%c0_21, %c0_22, %c0_23], %33 {strides = array<i32>} : memref<1x1x128xf32, #tpu.memory_space<vmem>>, vector<1x1x128xf32>,
    return
  }
  func.func @transform_0(%arg0: i32) -> (i32, i32) {
    %c0_i32 = arith.constant 0 : i32
    %c0_i32_0 = arith.constant 0 : i32
    return %arg0, %c0_i32 : i32, i32
  }
  func.func @transform_1(%arg0: i32) -> (i32, i32) {
    %c0_i32 = arith.constant 0 : i32
    %c0_i32_0 = arith.constant 0 : i32
    return %arg0, %c0_i32 : i32, i32
  }
  func.func @transform_2(%arg0: i32) -> (i32, i32) {
    %c0_i32 = arith.constant 0 : i32
    %c0_i32_0 = arith.constant 0 : i32
    %c0_i32_1 = arith.constant 0 : i32
    return %c0_i32, %c0_i32_0 : i32, i32
  }
  func.func @transform_3(%arg0: i32) -> (i32, i32) {
    %c0_i32 = arith.constant 0 : i32
    %c0_i32_0 = arith.constant 0 : i32
    %c0_i32_1 = arith.constant 0 : i32
    return %c0_i32, %c0_i32_0 : i32, i32
  }
  func.func @transform_4(%arg0: i32) -> (i32, i32) {
    %c0_i32 = arith.constant 0 : i32
    %c0_i32_0 = arith.constant 0 : i32
    %c0_i32_1 = arith.constant 0 : i32
    return %c0_i32, %c0_i32_0 : i32, i32
  }
  func.func @transform_5(%arg0: i32) -> (i32, i32) {
    %c0_i32 = arith.constant 0 : i32
    %c0_i32_0 = arith.constant 0 : i32
    %c0_i32_1 = arith.constant 0 : i32
    return %c0_i32, %c0_i32_0 : i32, i32
  }
  func.func @transform_6(%arg0: i32) -> (i32, i32) {
    %c0_i32 = arith.constant 0 : i32
    %c0_i32_0 = arith.constant 0 : i32
    %c0_i32_1 = arith.constant 0 : i32
    return %c0_i32, %c0_i32_0 : i32, i32
  }
  func.func @transform_7(%arg0: i32) -> (i32, i32) {
    %c0_i32 = arith.constant 0 : i32
    %c0_i32_0 = arith.constant 0 : i32
    %c0_i32_1 = arith.constant 0 : i32
    return %c0_i32, %c0_i32_0 : i32, i32
  }
  func.func @transform_8(%arg0: i32) -> i32 {
    %c0_i32 = arith.constant 0 : i32
    %c0_i32_0 = arith.constant 0 : i32
    return %c0_i32 : i32
  }
  func.func @transform_9(%arg0: i32) -> (i32, i32, i32) {
    %c0_i32 = arith.constant 0 : i32
    %c0_i32_0 = arith.constant 0 : i32
    %c0_i32_1 = arith.constant 0 : i32
    return %arg0, %c0_i32, %c0_i32_0 : i32, i32, i32
  }
}

</mosaic_0001>

<bundles_post_ra>
// kernel: tpu_custom_call.1
= control target key start
LH: loop header
LB: loop body
LE: loop exit
PB: predicated region body
PF: predicated region fallthrough
CT: control target
= control target key end

     0   :  { %vm95_vm0 = vcmask 130048   ;;  %s1145_s0 = inlined_call_operand.vmem [shape: f32[128,32], index: 0, kind: input, shape index: {}]   ;;  %s1146_s1 = inlined_call_operand.vmem [shape: f32[128,16], index: 1, kind: input, shape index: {}]   ;;  %s1147_s2 = inlined_call_operand.vmem [shape: bf16[32,128], index: 2, kind: input, shape index: {}]   ;;  %s1148_s3 = inlined_call_operand.vmem [shape: bf16[16,128], index: 3, kind: input, shape index: {}]   ;;  %s1149_s4 = inlined_call_operand.vmem [shape: f32[1,128], index: 4, kind: input, shape index: {}]   ;;  %s1150_s5 = inlined_call_operand.vmem [shape: bf16[128,128], index: 5, kind: input, shape index: {}]   ;;  %s1151_s6 = inlined_call_operand.vmem [shape: f32[1,128], index: 6, kind: input, shape index: {}]   ;;  %s1152_s7 = inlined_call_operand.vmem [shape: f32[1,128], index: 7, kind: input, shape index: {}]   ;;  %s1153_s8 = inlined_call_operand.<no memory space> [shape: f32[1], index: 8, kind: input, shape index: {}]   ;;  %s1154_s9 = inlined_call_operand.hbm [shape: f32[1,1,128], index: 9, kind: output, shape index: {}]  }
   0x1   :  { %v854_v0 = vld [vmem:[%s1148_s3] sm:$0xff]   ;;  %v64_v2 = vld [vmem:[%s1146_s1 + $0x8] sm:$0xff]  ;;  %v65_v3 = vld [vmem:[%s1146_s1 + $0x10] sm:$0xff] }
   0x2   :  { %v63_v1 = vld [vmem:[%s1146_s1] sm:$0xff]  ;;  %767 = vmatprep.subr.bf16.mxu0 %v854_v0  ;;  %v66_v5 = vld [vmem:[%s1146_s1 + $0x18] sm:$0xff]  ;;  %v68_v9 = vld [vmem:[%s1146_s1 + $0x28] sm:$0xff] }
   0x3   :  { %v79_v4 = vpack.c.bf16 %v64_v2, %v63_v1  ;;  %768 = vmatpush3.bf16.msra.mxu0 %v854_v0  ;;  %v80_v6 = vpack.c.bf16 %v66_v5, %v65_v3  ;;  %v855_v7 = vld [vmem:[%s1147_s2] sm:$0xff]   ;;  %v856_v11 = vld [vmem:[%s1147_s2 + $0x8] sm:$0xff]   ;;  %v69_v12 = vld [vmem:[%s1146_s1 + $0x30] sm:$0xff] }
   0x4   :  { %v67_v8 = vld [vmem:[%s1146_s1 + $0x20] sm:$0xff]  ;;  %785 = vmatprep.subr.bf16.mxu0 %v855_v7  ;;  %v70_v13 = vld [vmem:[%s1146_s1 + $0x38] sm:$0xff]  ;;  %v72_v15 = vld [vmem:[%s1146_s1 + $0x48] sm:$0xff] }
   0x5   :  { %769 = vmatprep.mubr.msk.bf16.mxu0 %vm95_vm0, %v79_v4  ;;  %v81_v10 = vpack.c.bf16 %v68_v9, %v67_v8  ;;  %v71_v14 = vld [vmem:[%s1146_s1 + $0x40] sm:$0xff]  ;;  %v82_v16 = vpack.c.bf16 %v70_v13, %v69_v12  ;;  %v73_v18 = vld [vmem:[%s1146_s1 + $0x50] sm:$0xff]  ;;  %v74_v19 = vld [vmem:[%s1146_s1 + $0x58] sm:$0xff] }
   0x6   :  { %770 = vmatmul.mubr.msk.bf16.vlgmr.msra.gmra.mrb[0].mxu0 %vm95_vm0, %v80_v6  ;;  %v83_v17 = vpack.c.bf16 %v72_v15, %v71_v14  ;;  %v75_v20 = vld [vmem:[%s1146_s1 + $0x60] sm:$0xff]  ;;  %v858_v22 = vld [vmem:[%s1150_s5 + $0x8] sm:$0xff]   ;;  %v84_v24 = vpack.c.bf16 %v74_v19, %v73_v18  ;;  %v859_v25 = vld [vmem:[%s1150_s5 + $0x10] sm:$0xff]  }
   0x7   :  { %786 = vmatpush3.bf16.msra.mxu0 %v855_v7  ;;  %773 = vmatprep.mubr.msk.bf16.mxu0 %vm95_vm0, %v81_v10  ;;  %v857_v21 = vld [vmem:[%s1150_s5] sm:$0xff]   ;;  %v76_v23 = vld [vmem:[%s1146_s1 + $0x68] sm:$0xff] }
   0x8   :  { %787 = vmatprep.subr.bf16.mxu0 %v856_v11  ;;  %805 = vmatprep.subr.bf16.mxu1 %v857_v21  ;;  %v85_v26 = vpack.c.bf16 %v76_v23, %v75_v20 }
   0x9   :  { %806 = vmatpush3.bf16.msra.mxu1 %v857_v21 }
   0xa   :  { %807 = vmatprep.subr.bf16.mxu1 %v858_v22 }
   0xb   :  { %788 = vmatpush3.bf16.msra.mxu0 %v856_v11 }
   0xd   :  { %808 = vmatpush3.bf16.msra.mxu1 %v858_v22 }
   0xe   :  { %774 = vmatmul.mubr.msk.bf16.gmra.mrb[4].mxu0 %vm95_vm0, %v82_v16 }
   0xf   :  { %777 = vmatprep.mubr.msk.bf16.mxu0 %vm95_vm0, %v83_v17 }
  0x10   :  { %15 = vsyncpa [#allocation4], 0  ;;  %809 = vmatprep.subr.bf16.mxu1 %v859_v25  ;;  %v860_v27 = vld [vmem:[%s1150_s5 + $0x18] sm:$0xff]   ;;  %v77_v28 = vld [vmem:[%s1146_s1 + $0x70] sm:$0xff]  ;;  %vm229_vm1 = vcmask 261120  }
  0x11   :  { %v78_v29 = vld [vmem:[%s1146_s1 + $0x78] sm:$0xff]  ;;  %v35_v30 = vld [vmem:[%s1145_s0] sm:$0xff]  ;;  %v36_v31 = vld [vmem:[%s1145_s0 + $0x8] sm:$0xff]  ;;  %810 = vmatpush3.bf16.msra.mxu1 %v859_v25 }
  0x12   :  { %v86_v32 = vpack.c.bf16 %v78_v29, %v77_v28  ;;  %811 = vmatprep.subr.bf16.mxu1 %v860_v27  ;;  %v861_v33 = vld [vmem:[%s1150_s5 + $0x20] sm:$0xff]   ;;  %v51_v34 = vpack.c.bf16 %v36_v31, %v35_v30  ;;  %v862_v35 = vld [vmem:[%s1150_s5 + $0x28] sm:$0xff]   ;;  %v37_v36 = vld [vmem:[%s1145_s0 + $0x10] sm:$0xff] }
  0x13   :  { %v38_v37 = vld [vmem:[%s1145_s0 + $0x18] sm:$0xff]  ;;  %v39_v38 = vld [vmem:[%s1145_s0 + $0x20] sm:$0xff]  ;;  %v40_v39 = vld [vmem:[%s1145_s0 + $0x28] sm:$0xff] }
  0x14   :  { %v52_v40 = vpack.c.bf16 %v38_v37, %v37_v36  ;;  %v53_v41 = vpack.c.bf16 %v40_v39, %v39_v38  ;;  %v41_v42 = vld [vmem:[%s1145_s0 + $0x30] sm:$0xff]  ;;  %v42_v43 = vld [vmem:[%s1145_s0 + $0x38] sm:$0xff]  ;;  %v43_v44 = vld [vmem:[%s1145_s0 + $0x40] sm:$0xff] }
  0x15   :  { %812 = vmatpush3.bf16.msra.mxu1 %v860_v27  ;;  %v44_v45 = vld [vmem:[%s1145_s0 + $0x48] sm:$0xff]  ;;  %v54_v46 = vpack.c.bf16 %v42_v43, %v41_v42  ;;  %v45_v48 = vld [vmem:[%s1145_s0 + $0x50] sm:$0xff]  ;;  %v46_v49 = vld [vmem:[%s1145_s0 + $0x58] sm:$0xff] }
  0x16   :  { %778 = vmatmul.mubr.msk.bf16.gmra.mrb[8].mxu0 %vm95_vm0, %v84_v24  ;;  %813 = vmatprep.subr.bf16.mxu1 %v861_v33  ;;  %v55_v47 = vpack.c.bf16 %v44_v45, %v43_v44  ;;  %v47_v50 = vld [vmem:[%s1145_s0 + $0x60] sm:$0xff]  ;;  %v48_v51 = vld [vmem:[%s1145_s0 + $0x68] sm:$0xff]  ;;  %v56_v52 = vpack.c.bf16 %v46_v49, %v45_v48  ;;  %v49_v54 = vld [vmem:[%s1145_s0 + $0x70] sm:$0xff] }
  0x17   :  { %781 = vmatprep.mubr.msk.bf16.mxu0 %vm95_vm0, %v85_v26  ;;  %v57_v53 = vpack.c.bf16 %v48_v51, %v47_v50  ;;  %v50_v55 = vld [vmem:[%s1145_s0 + $0x78] sm:$0xff]  ;;  %v863_v57 = vld [vmem:[%s1150_s5 + $0x30] sm:$0xff]   ;;  %v721_v59 = vld [vmem:[%s1149_s4] ss:$0 sm:$0xff] }
  0x18   :  { %v58_v56 = vpack.c.bf16 %v50_v55, %v49_v54  ;;  %v864_v58 = vld [vmem:[%s1150_s5 + $0x38] sm:$0xff]  }
  0x19   :  { %814 = vmatpush3.bf16.msra.mxu1 %v861_v33 }
  0x1a   :  { %815 = vmatprep.subr.bf16.mxu1 %v862_v35 }
  0x1d   :  { %816 = vmatpush3.bf16.msra.mxu1 %v862_v35 }
  0x1e   :  { %782 = vmatmul.mubr.msk.bf16.gmra.mrb[12].mxu0 %vm95_vm0, %v86_v32  ;;  %817 = vmatprep.subr.bf16.mxu1 %v863_v57 }
  0x1f   :  { %789 = vmatprep.mubr.msk.bf16.mxu0 %vm229_vm1, %v51_v34 }
  0x21   :  { %818 = vmatpush3.bf16.msra.mxu1 %v863_v57 }
  0x22   :  { %819 = vmatprep.subr.bf16.mxu1 %v864_v58 }
  0x25   :  { %820 = vmatpush3.bf16.msra.mxu1 %v864_v58  ;;  %v1098_v58 = vld [vmem:[%s1152_s7] ss:$0 sm:$0xff] }
  0x26   :  { %790 = vmatmul.mubr.msk.bf16.vlgmr.msra.gmra.mrb[0].mxu0 %vm229_vm1, %v52_v40 }
  0x27   :  { %793 = vmatprep.mubr.msk.bf16.mxu0 %vm229_vm1, %v53_v41 }
  0x2e   :  { %794 = vmatmul.mubr.msk.bf16.gmra.mrb[4].mxu0 %vm229_vm1, %v54_v46 }
  0x2f   :  { %797 = vmatprep.mubr.msk.bf16.mxu0 %vm229_vm1, %v55_v47 }
  0x36   :  { %798 = vmatmul.mubr.msk.bf16.gmra.mrb[8].mxu0 %vm229_vm1, %v56_v52  ;;  %v1091_v52 = vld [vmem:[%s1151_s6] ss:$0 sm:$0xff] }
  0x37   :  { %801 = vmatprep.mubr.msk.bf16.mxu0 %vm229_vm1, %v57_v53 }
  0x3e   :  { %802 = vmatmul.mubr.msk.bf16.gmra.mrb[12].mxu0 %vm229_vm1, %v58_v56 }
  0xf9   :  { %v791_v60 = vpop.f32.mrb[0].mxu0 }
  0xfa   :  { %v360_v61 = vadd.f32 %v791_v60, %v721_v59  ;;  %v288_v62 = vpop.f32.mrb[1].mxu0 }
  0xfb   :  { %v358_v63 = vadd.f32 %v721_v59, %v288_v62  ;;  %v792_v0 = vpop.f32.mrb[2].mxu0 }
  0xfc   :  { %v361_v1 = vadd.f32 %v792_v0, %v721_v59  ;;  %v291_v2 = vpop.f32.mrb[3].mxu0  ;;  %v376_v4 = vmax.f32 %v360_v61, 0.0 }
  0xfd   :  { %v359_v3 = vadd.f32 %v721_v59, %v291_v2  ;;  %v374_v6 = vmax.f32 %v358_v63, 0.0 }
  0xfe   :  { %v377_v5 = vmax.f32 %v361_v1, 0.0 }
  0xff   :  { %v375_v7 = vmax.f32 %v359_v3, 0.0 }
 0x100   :  { %v391_v8 = vpack.c.bf16 %v377_v5, %v376_v4 }
 0x101   :  { %v795_v9 = vpop.f32.mrb[4].mxu0  ;;  %v390_v10 = vpack.c.bf16 %v375_v7, %v374_v6 }
 0x102   :  { %v364_v11 = vadd.f32 %v795_v9, %v721_v59  ;;  %v304_v12 = vpop.f32.mrb[5].mxu0 }
 0x103   :  { %v362_v13 = vadd.f32 %v721_v59, %v304_v12  ;;  %v796_v14 = vpop.f32.mrb[6].mxu0  ;;  %821 = vmatprep.mubr.bf16.mxu1 %v390_v10 }
 0x104   :  { %v365_v15 = vadd.f32 %v796_v14, %v721_v59  ;;  %v307_v16 = vpop.f32.mrb[7].mxu0  ;;  %822 = vmatmul.mubr.bf16.vlgmr.msra.gmra.mrb[0].mxu1 %v391_v8  ;;  %v380_v18 = vmax.f32 %v364_v11, 0.0 }
 0x105   :  { %v363_v17 = vadd.f32 %v721_v59, %v307_v16  ;;  %v378_v20 = vmax.f32 %v362_v13, 0.0 }
 0x106   :  { %v381_v19 = vmax.f32 %v365_v15, 0.0 }
 0x107   :  { %v379_v21 = vmax.f32 %v363_v17, 0.0 }
 0x108   :  { %v393_v22 = vpack.c.bf16 %v381_v19, %v380_v18 }
 0x109   :  { %v392_v23 = vpack.c.bf16 %v379_v21, %v378_v20  ;;  %v799_v24 = vpop.f32.mrb[8].mxu0 }
 0x10a   :  { %v368_v25 = vadd.f32 %v799_v24, %v721_v59  ;;  %v320_v26 = vpop.f32.mrb[9].mxu0 }
 0x10b   :  { %v366_v27 = vadd.f32 %v721_v59, %v320_v26  ;;  %v800_v28 = vpop.f32.mrb[10].mxu0  ;;  %825 = vmatprep.mubr.bf16.mxu1 %v392_v23 }
 0x10c   :  { %v369_v29 = vadd.f32 %v800_v28, %v721_v59  ;;  %v323_v30 = vpop.f32.mrb[11].mxu0  ;;  %826 = vmatmul.mubr.bf16.gmra.mrb[4].mxu1 %v393_v22  ;;  %v384_v32 = vmax.f32 %v368_v25, 0.0 }
 0x10d   :  { %v367_v31 = vadd.f32 %v721_v59, %v323_v30  ;;  %v382_v34 = vmax.f32 %v366_v27, 0.0 }
 0x10e   :  { %v385_v33 = vmax.f32 %v369_v29, 0.0 }
 0x10f   :  { %v383_v35 = vmax.f32 %v367_v31, 0.0 }
 0x110   :  { %v395_v36 = vpack.c.bf16 %v385_v33, %v384_v32 }
 0x111   :  { %v394_v37 = vpack.c.bf16 %v383_v35, %v382_v34  ;;  %v803_v38 = vpop.f32.mrb[12].mxu0 }
 0x112   :  { %v372_v39 = vadd.f32 %v803_v38, %v721_v59  ;;  %v336_v40 = vpop.f32.mrb[13].mxu0 }
 0x113   :  { %v370_v41 = vadd.f32 %v721_v59, %v336_v40  ;;  %v804_v42 = vpop.f32.mrb[14].mxu0  ;;  %829 = vmatprep.mubr.bf16.mxu1 %v394_v37 }
 0x114   :  { %v373_v43 = vadd.f32 %v804_v42, %v721_v59  ;;  %v339_v44 = vpop.f32.mrb[15].mxu0  ;;  %830 = vmatmul.mubr.bf16.gmra.mrb[8].mxu1 %v395_v36  ;;  %v388_v46 = vmax.f32 %v372_v39, 0.0 }
 0x115   :  { %v371_v45 = vadd.f32 %v721_v59, %v339_v44  ;;  %v386_v48 = vmax.f32 %v370_v41, 0.0 }
 0x116   :  { %v389_v47 = vmax.f32 %v373_v43, 0.0 }
 0x117   :  { %v387_v49 = vmax.f32 %v371_v45, 0.0 }
 0x118   :  { %v397_v50 = vpack.c.bf16 %v389_v47, %v388_v46 }
 0x119   :  { %v396_v51 = vpack.c.bf16 %v387_v49, %v386_v48 }
 0x11b   :  { %833 = vmatprep.mubr.bf16.mxu1 %v396_v51 }
 0x11c   :  { %834 = vmatmul.mubr.bf16.gmra.mrb[12].mxu1 %v397_v50 }
 0x1d7   :  { %v823_v53 = vpop.f32.mrb[0].mxu1 }
 0x1d8   :  { %v512_v54 = vadd.f32 %v823_v53, %v1091_v52  ;;  %v503_v55 = vpop.f32.mrb[1].mxu1 }
 0x1d9   :  { %v504_v56 = vadd.f32 %v1091_v52, %v503_v55  ;;  %v824_v57 = vpop.f32.mrb[2].mxu1 }
 0x1da   :  { %v568_v59 = vmax.f32 %v512_v54, 0.0  ;;  %v515_v60 = vadd.f32 %v824_v57, %v1091_v52  ;;  %v506_v61 = vpop.f32.mrb[3].mxu1 }
 0x1db   :  { %v566_v62 = vmax.f32 %v504_v56, 0.0  ;;  %v507_v63 = vadd.f32 %v1091_v52, %v506_v61 }
 0x1dc   :  { %v569_v0 = vmax.f32 %v515_v60, 0.0  ;;  %v591_v1 = vmul.f32 %v1098_v58, %v568_v59 }
 0x1dd   :  { %v567_v2 = vmax.f32 %v507_v63, 0.0  ;;  %v589_v3 = vmul.f32 %v1098_v58, %v566_v62 }
 0x1de   :  { %609 = vadd.xlane.f32.xlu1 %v591_v1  ;;  %v592_v7 = vmul.f32 %v1098_v58, %v569_v0 }
 0x1df   :  { %605 = vadd.xlane.f32.xlu0 %v589_v3  ;;  %v827_v4 = vpop.f32.mrb[4].mxu1  ;;  %v590_v10 = vmul.f32 %v1098_v58, %v567_v2 }
 0x1e0   :  { %v528_v5 = vadd.f32 %v827_v4, %v1091_v52  ;;  %v519_v6 = vpop.f32.mrb[5].mxu1 }
 0x1e1   :  { %v520_v8 = vadd.f32 %v1091_v52, %v519_v6  ;;  %v828_v9 = vpop.f32.mrb[6].mxu1 }
 0x1e2   :  { %v572_v11 = vmax.f32 %v528_v5, 0.0  ;;  %611 = vadd.xlane.f32.xlu1 %v592_v7  ;;  %v522_v12 = vpop.f32.mrb[7].mxu1  ;;  %v531_v13 = vadd.f32 %v828_v9, %v1091_v52 }
 0x1e3   :  { %v523_v14 = vadd.f32 %v1091_v52, %v522_v12  ;;  %607 = vadd.xlane.f32.xlu0 %v590_v10  ;;  %v570_v16 = vmax.f32 %v520_v8, 0.0 }
 0x1e4   :  { %v595_v15 = vmul.f32 %v1098_v58, %v572_v11  ;;  %v573_v18 = vmax.f32 %v531_v13, 0.0 }
 0x1e5   :  { %v571_v17 = vmax.f32 %v523_v14, 0.0  ;;  %v593_v25 = vmul.f32 %v1098_v58, %v570_v16 }
 0x1e6   :  { %v596_v30 = vmul.f32 %v1098_v58, %v573_v18 }
 0x1e7   :  { %617 = vadd.xlane.f32.xlu0 %v595_v15  ;;  %v831_v19 = vpop.f32.mrb[8].mxu1  ;;  %v594_v20 = vmul.f32 %v1098_v58, %v571_v17 }
 0x1e8   :  { %v544_v21 = vadd.f32 %v831_v19, %v1091_v52  ;;  %v535_v22 = vpop.f32.mrb[9].mxu1 }
 0x1e9   :  { %v536_v23 = vadd.f32 %v1091_v52, %v535_v22  ;;  %615 = vadd.xlane.f32.xlu1 %v594_v20  ;;  %v832_v24 = vpop.f32.mrb[10].mxu1 }
 0x1ea   :  { %v576_v26 = vmax.f32 %v544_v21, 0.0  ;;  %v538_v27 = vpop.f32.mrb[11].mxu1  ;;  %v547_v28 = vadd.f32 %v832_v24, %v1091_v52 }
 0x1eb   :  { %v539_v29 = vadd.f32 %v1091_v52, %v538_v27  ;;  %613 = vadd.xlane.f32.xlu0 %v593_v25  ;;  %v574_v32 = vmax.f32 %v536_v23, 0.0 }
 0x1ec   :  { %v599_v31 = vmul.f32 %v1098_v58, %v576_v26  ;;  %v577_v34 = vmax.f32 %v547_v28, 0.0 }
 0x1ed   :  { %v575_v33 = vmax.f32 %v539_v29, 0.0  ;;  %619 = vadd.xlane.f32.xlu1 %v596_v30  ;;  %v597_v41 = vmul.f32 %v1098_v58, %v574_v32 }
 0x1ee   :  { %v600_v46 = vmul.f32 %v1098_v58, %v577_v34 }
 0x1ef   :  { %625 = vadd.xlane.f32.xlu0 %v599_v31  ;;  %v835_v35 = vpop.f32.mrb[12].mxu1  ;;  %v598_v36 = vmul.f32 %v1098_v58, %v575_v33 }
 0x1f0   :  { %v560_v37 = vadd.f32 %v835_v35, %v1091_v52  ;;  %v551_v38 = vpop.f32.mrb[13].mxu1 }
 0x1f1   :  { %v552_v39 = vadd.f32 %v1091_v52, %v551_v38  ;;  %623 = vadd.xlane.f32.xlu1 %v598_v36  ;;  %v836_v40 = vpop.f32.mrb[14].mxu1 }
 0x1f2   :  { %v580_v42 = vmax.f32 %v560_v37, 0.0  ;;  %v554_v43 = vpop.f32.mrb[15].mxu1  ;;  %v563_v44 = vadd.f32 %v836_v40, %v1091_v52 }
 0x1f3   :  { %v555_v45 = vadd.f32 %v1091_v52, %v554_v43  ;;  %621 = vadd.xlane.f32.xlu0 %v597_v41  ;;  %v578_v48 = vmax.f32 %v552_v39, 0.0  ;;  %v638_v52 = vstv %s1153_s8  ;;  %s889_s8 = smov [#allocation3]  }
 0x1f4   :  { %v603_v47 = vmul.f32 %v1098_v58, %v580_v42  ;;  %v581_v50 = vmax.f32 %v563_v44, 0.0  ;;  %s694_s26 = sshll.u32 %s889_s8, 4  ;;  %s695_s26 = int_to_ptr.vmem [resolvable:$true] %s694_s26 }
 0x1f5   :  { %v579_v49 = vmax.f32 %v555_v45, 0.0  ;;  %627 = vadd.xlane.f32.xlu1 %v600_v46  ;;  %v601_v53 = vmul.f32 %v1098_v58, %v578_v48  ;;  %s865_s27 = scalar_lea.vmem %s695_s26, 16  ;;  %s869_s28 = scalar_lea.vmem %s695_s26, 32 }
 0x1f6   :  { %v604_v54 = vmul.f32 %v1098_v58, %v581_v50  ;;  %p866_p0 = scmp.ne.s32.totalorder %s695_s26, %s865_s27  ;;  %p870_p1 = scmp.lt.s32.totalorder %s695_s26, %s695_s26 }
 0x1f7   :  { %633 = vadd.xlane.f32.xlu0 %v603_v47  ;;  %v602_v51 = vmul.f32 %v1098_v58, %v579_v49  ;;  %p871_p2 = scmp.lt.s32.totalorder %s869_s28, %s865_s27 }
 0x1f9   :  { %631 = vadd.xlane.f32.xlu1 %v602_v51  ;;  %p872_p3 = por %p871_p2, %p870_p1 }
 0x1fb   :  { %629 = vadd.xlane.f32.xlu0 %v601_v53  ;;  %p873_p4 = pnand %p872_p3, %p866_p0 }
 0x1fd   :  { %635 = vadd.xlane.f32.xlu1 %v604_v54 }
 0x26b   :  { %v610_v57 = vpop.xlane.xlu1 %609 }
 0x26c   :  { %v606_v55 = vpop.xlane.xlu0 %605  ;;  %v641_v62 = vadd.f32 %v638_v52, %v610_v57 }
 0x26d   :  { %v639_v56 = vadd.f32 %v638_v52, %v606_v55 }
 0x26f   :  { %655 = vxpose.xlu0.b32.start [1/16] (narrow) %v639_v56, 8  ;;  %v612_v63 = vpop.xlane.xlu1 %611 }
 0x270   :  { %v608_v59 = vpop.xlane.xlu0 %607  ;;  %v642_v0 = vadd.f32 %v638_v52, %v612_v63 }
 0x271   :  { %v640_v60 = vadd.f32 %v638_v52, %v608_v59 }
 0x273   :  { %656 = vxpose.xlu0.b32.cont [2/16] (narrow) %v640_v60, 8 }
 0x274   :  { %v618_v61 = vpop.xlane.xlu0 %617 }
 0x275   :  { %v645_v5 = vadd.f32 %v638_v52, %v618_v61 }
 0x276   :  { %v616_v2 = vpop.xlane.xlu1 %615 }
 0x277   :  { %657 = vxpose.xlu0.b32.cont [3/16] (narrow) %v641_v62, 8  ;;  %v644_v3 = vadd.f32 %v638_v52, %v616_v2 }
 0x278   :  { %v614_v1 = vpop.xlane.xlu0 %613 }
 0x279   :  { %v643_v58 = vadd.f32 %v638_v52, %v614_v1 }
 0x27a   :  { %v620_v6 = vpop.xlane.xlu1 %619 }
 0x27b   :  { %658 = vxpose.xlu0.b32.cont [4/16] (narrow) %v642_v0, 8  ;;  %v646_v7 = vadd.f32 %v638_v52, %v620_v6 }
 0x27c   :  { %v626_v4 = vpop.xlane.xlu0 %625 }
 0x27d   :  { %v649_v13 = vadd.f32 %v638_v52, %v626_v4 }
 0x27e   :  { %v624_v10 = vpop.xlane.xlu1 %623 }
 0x27f   :  { %659 = vxpose.xlu0.b32.cont [5/16] (narrow) %v643_v58, 8  ;;  %v648_v11 = vadd.f32 %v638_v52, %v624_v10 }
 0x280   :  { %v622_v8 = vpop.xlane.xlu0 %621 }
 0x281   :  { %v647_v9 = vadd.f32 %v638_v52, %v622_v8 }
 0x282   :  { %v628_v14 = vpop.xlane.xlu1 %627 }
 0x283   :  { %660 = vxpose.xlu0.b32.cont [6/16] (narrow) %v644_v3, 8  ;;  %v650_v15 = vadd.f32 %v638_v52, %v628_v14 }
 0x284   :  { %v634_v12 = vpop.xlane.xlu0 %633 }
 0x285   :  { %v653_v20 = vadd.f32 %v638_v52, %v634_v12 }
 0x286   :  { %v632_v18 = vpop.xlane.xlu1 %631 }
 0x287   :  { %661 = vxpose.xlu0.b32.cont [7/16] (narrow) %v645_v5, 8  ;;  %v652_v19 = vadd.f32 %v638_v52, %v632_v18 }
 0x288   :  { %v630_v16 = vpop.xlane.xlu0 %629 }
 0x289   :  { %v651_v17 = vadd.f32 %v638_v52, %v630_v16 }
 0x28a   :  { %v636_v21 = vpop.xlane.xlu1 %635 }
 0x28b   :  { %662 = vxpose.xlu0.b32.cont [8/16] (narrow) %v646_v7, 8  ;;  %v654_v22 = vadd.f32 %v638_v52, %v636_v21 }
 0x28f   :  { %663 = vxpose.xlu0.b32.cont [9/16] (narrow) %v647_v9, 8 }
 0x293   :  { %664 = vxpose.xlu0.b32.cont [10/16] (narrow) %v648_v11, 8 }
 0x297   :  { %665 = vxpose.xlu0.b32.cont [11/16] (narrow) %v649_v13, 8 }
 0x29b   :  { %666 = vxpose.xlu0.b32.cont [12/16] (narrow) %v650_v15, 8 }
 0x29f   :  { %667 = vxpose.xlu0.b32.cont [13/16] (narrow) %v651_v17, 8 }
 0x2a3   :  { %668 = vxpose.xlu0.b32.cont [14/16] (narrow) %v652_v19, 8 }
 0x2a7   :  { %669 = vxpose.xlu0.b32.cont [15/16] (narrow) %v653_v20, 8 }
 0x2ab   :  { %670 = vxpose.xlu0.b32.end [16/16] (narrow) %v654_v22, 8 }
 0x2ef   :  { %v671_v23 = vpop.trf.xlu0 }
 0x2f0   :  { %687 = vst [vmem:[#allocation3] sm:$0x1] %v671_v23 }
 0x2f1   :  { %876 = shalt.err (!%p873_p4)
}
 0x2f2   :  { %s877_s10 = scalar_lea.hbm %s1154_s9, 16 }
 0x2f3   :  { %p878_p5 = scmp.ne.s32.totalorder %s1154_s9, %s877_s10  ;;  %p881_p6 = scmp.lt.u32.totalorder %s877_s10, %s1154_s9 }
 0x2f5   :  { %p883_p7 = pnand %p881_p6, %p878_p5 }
 0x2f7   :  { %886 = shalt.err (!%p883_p7)
}
 0x2f8   :  { %697 = dma.vmem_to_hbm [thread:$0]  %s695_s26, 16, %s1154_s9, [#allocation4]  }
 0x2f9   :  { %887 = dma.done.wait [#allocation4], 16  }
 0x2fa   :  { %888 = vsyncadd [#allocation4], 4294967280 }
 0x2fb   :  { %701 = vsyncpa [#allocation4], 1 }

</bundles_post_ra>
